<compile_context>
chip_gen: v7x
topology: tpu7x:2x2x1
jax: 0.10.0
libtpu: 0.0.40
codegen_flags: <defaults>
</compile_context>

<pallas_src>
import math

import jax
import jax.numpy as jnp
from jax import lax
from jax.experimental import pallas as pl
from jax.experimental.pallas import tpu as pltpu


# --------------------------------------------------------------------------
# Kernels
# --------------------------------------------------------------------------
def _project_kv_kernel(xd_ref, wk_ref, bk_ref, wv_ref, bv_ref, k_ref, v_ref):
    # xd_ref: (1, Cin, tk) bf16; wk/wv: (C, Cin) bf16; bk/bv: (C, 1) f32
    # k_ref/v_ref: (1, C, tk) bf16
    xd = xd_ref[0]
    k = jnp.dot(wk_ref[...], xd, preferred_element_type=jnp.float32) + bk_ref[...]
    v = jnp.dot(wv_ref[...], xd, preferred_element_type=jnp.float32) + bv_ref[...]
    k_ref[0] = k.astype(k_ref.dtype)
    v_ref[0] = v.astype(v_ref.dtype)


def _nonlocal_single_kernel(x_ref, k_ref, v_ref, wq_ref, bq_ref, bias_ref, out_ref):
    # One-pass softmax fast path (n_k_tiles == 1): no online-softmax scratch,
    # no alpha rescale of acc/l.
    x = x_ref[0]                                                         # (Cin, tq) f32
    q = (jnp.dot(wq_ref[...], x.astype(jnp.bfloat16),
                 preferred_element_type=jnp.float32)
         + bq_ref[...]).astype(jnp.bfloat16)                             # (C, tq) bf16
    k = k_ref[0]                                                         # (C, Nk) bf16
    v = v_ref[0]                                                         # (C, Nk) bf16
    # s[i, j] = sum_c k[c, i] * q[c, j]; key-padding bias per key row.
    s = lax.dot_general(k, q, (((0,), (0,)), ((), ())),
                        preferred_element_type=jnp.float32) + bias_ref[...]
    m = jnp.max(s, axis=0, keepdims=True)                                # (1, tq)
    p = jnp.exp(s - m)                                                   # (Nk, tq)
    l = jnp.sum(p, axis=0, keepdims=True)                                # (1, tq)
    o = jnp.dot(v, p.astype(jnp.bfloat16), preferred_element_type=jnp.float32)
    out_ref[0] = (x + o * pl.reciprocal(l, approx=True)).astype(out_ref.dtype)


def _nonlocal_flash_kernel(x_ref, k_ref, v_ref, wq_ref, bq_ref, bias_ref, out_ref,
                           q_sc, m_sc, l_sc, acc_sc):
    # x_ref  : (1, Cin, tq) f32 (query input + residual)
    # k_ref  : (1, C, tk)  bf16 (precomputed key tile)
    # v_ref  : (1, C, tk)  bf16 (precomputed value tile)
    # wq_ref : (C, Cin) bf16 (scale already folded), bq_ref: (C, 1) f32
    # bias_ref: (tk, 1) f32   key-padding bias (0 valid / -1e30 padded)
    # q_sc: (C, tq) bf16, m_sc/l_sc: (1, tq) f32, acc_sc: (C, tq) f32
    ki = pl.program_id(2)

    @pl.when(ki == 0)
    def _init():
        x_bf = x_ref[0].astype(jnp.bfloat16)
        q = jnp.dot(wq_ref[...], x_bf,
                    preferred_element_type=jnp.float32) + bq_ref[...]
        q_sc[...] = q.astype(q_sc.dtype)
        m_sc[...] = jnp.full_like(m_sc, -jnp.inf)
        l_sc[...] = jnp.zeros_like(l_sc)
        acc_sc[...] = jnp.zeros_like(acc_sc)

    k = k_ref[0]                                                         # (C, tk) bf16
    v = v_ref[0]                                                         # (C, tk) bf16
    q = q_sc[...]                                                        # (C, tq) bf16
    s = lax.dot_general(k, q, (((0,), (0,)), ((), ())),
                        preferred_element_type=jnp.float32) + bias_ref[...]  # (tk, tq)

    # Online softmax over the key axis.
    m_prev = m_sc[...]
    m_new = jnp.maximum(m_prev, jnp.max(s, axis=0, keepdims=True))       # (1, tq)
    alpha = jnp.exp(m_prev - m_new)
    p = jnp.exp(s - m_new)                                               # (tk, tq) f32
    l_sc[...] = alpha * l_sc[...] + jnp.sum(p, axis=0, keepdims=True)
    acc_sc[...] = alpha * acc_sc[...] + jnp.dot(v, p.astype(jnp.bfloat16),
                                                preferred_element_type=jnp.float32)
    m_sc[...] = m_new

    @pl.when(ki == pl.num_programs(2) - 1)
    def _finalize():
        inv_l = pl.reciprocal(l_sc[...], approx=True)                    # EUP slot
        out_ref[0] = (x_ref[0] + acc_sc[...] * inv_l).astype(out_ref.dtype)


# --------------------------------------------------------------------------
# Tiling / budgeting helpers
# --------------------------------------------------------------------------
def _round_up(n, m):
    return ((n + m - 1) // m) * m


def _vmem_capacity_bytes():
    try:
        return int(pltpu.get_tpu_info().vmem_capacity_bytes)
    except Exception:
        return 64 * 1024 * 1024   # conservative (v7x per-TensorCore)


def _flash_vmem_bytes(cin, c, tq, tk):
    f32, bf16, dbl = 4, 2, 2
    tiles = (cin * tq * f32 + 2 * c * tk * bf16 + c * tq * f32) * dbl   # x, k, v, out
    consts = (c * cin * bf16 + c * f32 + tk * f32) * dbl                # wq, bq, bias
    scratch = c * tq * bf16 + 2 * tq * f32 + c * tq * f32               # q, m, l, acc
    interm = 3 * tk * tq * f32                                          # s / p temporaries
    return tiles + consts + scratch + interm


def _pick_tiles(nq_pad, nk_pad, cin, c, budget, tile_cap):
    cands = [t for t in (1024, 512, 256, 128) if t <= tile_cap]
    q_cands = [t for t in cands if nq_pad % t == 0] or [128]
    k_cands = [t for t in cands if nk_pad % t == 0] or [128]
    for tq in q_cands:
        for tk in k_cands:
            if _flash_vmem_bytes(cin, c, tq, tk) <= budget:
                return tq, tk
    return q_cands[-1], k_cands[-1]


# --------------------------------------------------------------------------
# Wrapper
# --------------------------------------------------------------------------
def nonlocal_forward(x_nchw, params, *, channels, downsample=False,
                     temperature=1.0, max_tile=None):
    """x_nchw: (B, Cin, H, W) float32.  Returns (B, Cin, H, W)."""
    B, Cin, H, W = x_nchw.shape
    assert Cin == channels, "residual add in reference forward requires channels == in_channels"

    # optional 2x2 max-pool on keys/values (matches nn.MaxPool2d(2, 2))
    if downsample:
        xd_nchw = lax.reduce_window(x_nchw, -jnp.inf, lax.max,
                                    (1, 1, 2, 2), (1, 1, 2, 2), "VALID")
    else:
        xd_nchw = x_nchw
    Hd, Wd = xd_nchw.shape[2], xd_nchw.shape[3]

    Nq, Nk = H * W, Hd * Wd
    Nq_pad, Nk_pad = _round_up(Nq, 128), _round_up(Nk, 128)

    # Channels-first lane-dense layout: (B, C, N) is just a reshape of NCHW.
    x_bcn = x_nchw.reshape(B, Cin, Nq)
    xd_bcn = xd_nchw.reshape(B, Cin, Nk)
    if Nq_pad != Nq:
        x_bcn = jnp.pad(x_bcn, ((0, 0), (0, 0), (0, Nq_pad - Nq)))
    if Nk_pad != Nk:
        xd_bcn = jnp.pad(xd_bcn, ((0, 0), (0, 0), (0, Nk_pad - Nk)))

    # Additive score bias for padded key positions (0 valid / -1e30 padded).
    key_bias = jnp.where(jnp.arange(Nk_pad) < Nk, 0.0, -1e30)
    key_bias = key_bias.astype(jnp.float32).reshape(Nk_pad, 1)

    # Fold 1/(sqrt(C) * temperature) into the Q projection; cast MXU operands to bf16.
    inv_scale = 1.0 / (math.sqrt(channels) * temperature)
    wq = (params["wq"] * inv_scale).astype(jnp.bfloat16)
    bq = (params["bq"] * inv_scale).reshape(channels, 1).astype(jnp.float32)
    wk = params["wk"].astype(jnp.bfloat16)
    bk = params["bk"].reshape(channels, 1).astype(jnp.float32)
    wv = params["wv"].astype(jnp.bfloat16)
    bv = params["bv"].reshape(channels, 1).astype(jnp.float32)
    xd_bf = xd_bcn.astype(jnp.bfloat16)

    # Generation-aware VMEM budget / tile choice.
    capacity = _vmem_capacity_bytes()
    vmem_limit = min(100 * 1024 * 1024, int(capacity * 0.75))
    tile_cap = 512 if capacity <= 64 * 1024 * 1024 else 1024   # cap tiles on v7x
    if max_tile is not None:
        tile_cap = max(128, min(tile_cap, max_tile))
    budget = int(vmem_limit * 0.6)
    tq, tk = _pick_tiles(Nq_pad, Nk_pad, Cin, channels, budget, tile_cap)

    # v7x: keep >= 2 'parallel' grid units so both TensorCores get work.
    if B * (Nq_pad // tq) < 2 and Nq_pad >= 2 * 128:
        half = Nq_pad // 2
        tq = half if (half % 128 == 0 and Nq_pad % half == 0) else 128

    n_q_tiles = Nq_pad // tq
    n_k_tiles = Nk_pad // tk
    full = lambda *_: (0, 0)

    # ---- K/V projection: computed ONCE per batch (not per query tile). ----
    k_bcn, v_bcn = pl.pallas_call(
        _project_kv_kernel,
        out_shape=(jax.ShapeDtypeStruct((B, channels, Nk_pad), jnp.bfloat16),
                   jax.ShapeDtypeStruct((B, channels, Nk_pad), jnp.bfloat16)),
        grid_spec=pltpu.PrefetchScalarGridSpec(
            num_scalar_prefetch=0,
            grid=(B, n_k_tiles),
            in_specs=[
                pl.BlockSpec((1, Cin, tk), lambda b, ki: (b, 0, ki)),
                pl.BlockSpec((channels, Cin), full),
                pl.BlockSpec((channels, 1), full),
                pl.BlockSpec((channels, Cin), full),
                pl.BlockSpec((channels, 1), full),
            ],
            out_specs=[pl.BlockSpec((1, channels, tk), lambda b, ki: (b, 0, ki)),
                       pl.BlockSpec((1, channels, tk), lambda b, ki: (b, 0, ki))]),
        compiler_params=pltpu.CompilerParams(
            dimension_semantics=("parallel", "parallel"),
            vmem_limit_bytes=vmem_limit),
    )(xd_bf, wk, bk, wv, bv)

    # ---- Attention + residual. ----
    if n_k_tiles == 1:
        # Fast path: whole key/value range fits one tile -> one-pass softmax.
        out_bcn = pl.pallas_call(
            _nonlocal_single_kernel,
            out_shape=jax.ShapeDtypeStruct((B, channels, Nq_pad), x_nchw.dtype),
            grid_spec=pltpu.PrefetchScalarGridSpec(
                num_scalar_prefetch=0,
                grid=(B, n_q_tiles),
                in_specs=[
                    pl.BlockSpec((1, Cin, tq), lambda b, qi: (b, 0, qi)),
                    pl.BlockSpec((1, channels, Nk_pad), lambda b, qi: (b, 0, 0)),
                    pl.BlockSpec((1, channels, Nk_pad), lambda b, qi: (b, 0, 0)),
                    pl.BlockSpec((channels, Cin), full),
                    pl.BlockSpec((channels, 1), full),
                    pl.BlockSpec((Nk_pad, 1), full),
                ],
                out_specs=pl.BlockSpec((1, channels, tq), lambda b, qi: (b, 0, qi))),
            compiler_params=pltpu.CompilerParams(
                dimension_semantics=("parallel", "parallel"),
                vmem_limit_bytes=vmem_limit),
        )(x_bcn, k_bcn, v_bcn, wq, bq, key_bias)
    else:
        out_bcn = pl.pallas_call(
            _nonlocal_flash_kernel,
            out_shape=jax.ShapeDtypeStruct((B, channels, Nq_pad), x_nchw.dtype),
            grid_spec=pltpu.PrefetchScalarGridSpec(
                num_scalar_prefetch=0,
                grid=(B, n_q_tiles, n_k_tiles),
                in_specs=[
                    pl.BlockSpec((1, Cin, tq), lambda b, qi, ki: (b, 0, qi)),
                    pl.BlockSpec((1, channels, tk), lambda b, qi, ki: (b, 0, ki)),
                    pl.BlockSpec((1, channels, tk), lambda b, qi, ki: (b, 0, ki)),
                    pl.BlockSpec((channels, Cin), lambda b, qi, ki: (0, 0)),
                    pl.BlockSpec((channels, 1), lambda b, qi, ki: (0, 0)),
                    pl.BlockSpec((tk, 1), lambda b, qi, ki: (ki, 0)),
                ],
                out_specs=pl.BlockSpec((1, channels, tq), lambda b, qi, ki: (b, 0, qi)),
                scratch_shapes=[
                    pltpu.VMEM((channels, tq), jnp.bfloat16),  # q tile (hoisted)
                    pltpu.VMEM((1, tq), jnp.float32),          # running max m
                    pltpu.VMEM((1, tq), jnp.float32),          # running denom l
                    pltpu.VMEM((channels, tq), jnp.float32),   # output accumulator
                ]),
            compiler_params=pltpu.CompilerParams(
                dimension_semantics=("parallel", "parallel", "arbitrary"),
                vmem_limit_bytes=vmem_limit),
        )(x_bcn, k_bcn, v_bcn, wq, bq, key_bias)

    out_bcn = out_bcn[:, :, :Nq]
    return out_bcn.reshape(B, channels, H, W)


# --------------------------------------------------------------------------
# Pure-JAX reference (matches the PyTorch forward) & params
# --------------------------------------------------------------------------
def nonlocal_reference(x, params, *, channels, downsample=False, temperature=1.0):
    B, Cin, H, W = x.shape
    if downsample:
        xd = lax.reduce_window(x, -jnp.inf, lax.max,
                               (1, 1, 2, 2), (1, 1, 2, 2), "VALID")
    else:
        xd = x
    q = jnp.einsum("oc,bchw->bohw", params["wq"], x) + params["bq"][None, :, None, None]
    k = jnp.einsum("oc,bchw->bohw", params["wk"], xd) + params["bk"][None, :, None, None]
    v = jnp.einsum("oc,bchw->bohw", params["wv"], xd) + params["bv"][None, :, None, None]
    q = q.reshape(B, channels, -1)
    k = k.reshape(B, channels, -1)
    v = v.reshape(B, channels, -1)
    sim = jnp.einsum("bcn,bcm->bnm", q, k) / (math.sqrt(channels) * temperature)
    attn = jax.nn.softmax(sim, axis=2)
    out = jnp.einsum("bnm,bcm->bcn", attn, v).reshape(B, channels, H, W)
    return x + out


def init_params(key, in_channels, channels):
    ks = jax.random.split(key, 6)
    s = 1.0 / math.sqrt(in_channels)
    return {
        "wq": jax.random.uniform(ks[0], (channels, in_channels), jnp.float32, -s, s),
        "bq": jax.random.uniform(ks[1], (channels,), jnp.float32, -s, s),
        "wk": jax.random.uniform(ks[2], (channels, in_channels), jnp.float32, -s, s),
        "bk": jax.random.uniform(ks[3], (channels,), jnp.float32, -s, s),
        "wv": jax.random.uniform(ks[4], (channels, in_channels), jnp.float32, -s, s),
        "bv": jax.random.uniform(ks[5], (channels,), jnp.float32, -s, s),
    }


if __name__ == "__main__":
    key = jax.random.PRNGKey(0)
    k_x, k_p = jax.random.split(key)

    B, C, H, W = 2, 4, 16, 16  # in_channels == channels == 4
    x = jax.random.normal(k_x, (B, C, H, W), jnp.float32)
    params = init_params(k_p, in_channels=C, channels=C)
    TOL = 6e-2  # bf16 MXU operands + approx reciprocal vs f32 reference

    # Case 1: no downsample (single-k-tile fast path, Nq == Nk == 256)
    out = nonlocal_forward(x, params, channels=C, downsample=False, temperature=1.0)
    jax.block_until_ready(out)
    assert out.shape == (B, C, H, W)
    ref = nonlocal_reference(x, params, channels=C, downsample=False, temperature=1.0)
    err = float(jnp.max(jnp.abs(out - ref)))
    assert err < TOL, f"mismatch (no downsample): {err}"

    # Case 2: 2x2 max-pool on keys/values (Nk == 64 -> padded to 128, masked)
    out_ds = nonlocal_forward(x, params, channels=C, downsample=True, temperature=0.5)
    jax.block_until_ready(out_ds)
    ref_ds = nonlocal_reference(x, params, channels=C, downsample=True, temperature=0.5)
    err_ds = float(jnp.max(jnp.abs(out_ds - ref_ds)))
    assert err_ds < TOL, f"mismatch (downsample): {err_ds}"

    # Case 3: force the multi-k-tile flash (online-softmax) path.
    out_fl = nonlocal_forward(x, params, channels=C, downsample=False,
                              temperature=1.0, max_tile=128)
    jax.block_until_ready(out_fl)
    err_fl = float(jnp.max(jnp.abs(out_fl - ref)))
    assert err_fl < TOL, f"mismatch (flash path): {err_fl}"

    # Case 4: non-128-aligned spatial size (Nq == Nk == 100 -> padded to 128).
    x2 = jax.random.normal(jax.random.PRNGKey(1), (1, C, 10, 10), jnp.float32)
    out_pad = nonlocal_forward(x2, params, channels=C, downsample=False, temperature=1.0)
    jax.block_until_ready(out_pad)
    ref_pad = nonlocal_reference(x2, params, channels=C, downsample=False, temperature=1.0)
    err_pad = float(jnp.max(jnp.abs(out_pad - ref_pad)))
    assert err_pad < TOL, f"mismatch (padded): {err_pad}"

    print("KERNEL_OK")
</pallas_src>

<mosaic_0001>
module attributes {stable_mosaic.version = 11 : i64} {
  func.func @_project_kv_kernel(%arg0: i32, %arg1: i32, %arg2: memref<1x4x256xbf16, #tpu.memory_space<vmem>>, %arg3: memref<4x4xbf16, #tpu.memory_space<vmem>>, %arg4: memref<4x1xf32, #tpu.memory_space<vmem>>, %arg5: memref<4x4xbf16, #tpu.memory_space<vmem>>, %arg6: memref<4x1xf32, #tpu.memory_space<vmem>>, %arg7: memref<1x4x256xbf16, #tpu.memory_space<vmem>>, %arg8: memref<1x4x256xbf16, #tpu.memory_space<vmem>>) attributes {dimension_semantics = [#tpu.dimension_semantics<parallel>, #tpu.dimension_semantics<parallel>], iteration_bounds = array<i64: 2, 1>, scalar_prefetch = 0 : i64, scratch_operands = 0 : i64, tpu.core_type = #tpu.core_type<tc>, window_params = [{transform_indices = @transform_0, window_bounds = array<i64: 1, 4, 256>}, {pipeline_mode = #tpu.pipeline_mode<synchronous>, transform_indices = @transform_1, window_bounds = array<i64: 4, 4>}, {pipeline_mode = #tpu.pipeline_mode<synchronous>, transform_indices = @transform_2, window_bounds = array<i64: 4, 1>}, {pipeline_mode = #tpu.pipeline_mode<synchronous>, transform_indices = @transform_3, window_bounds = array<i64: 4, 4>}, {pipeline_mode = #tpu.pipeline_mode<synchronous>, transform_indices = @transform_4, window_bounds = array<i64: 4, 1>}, {transform_indices = @transform_5, window_bounds = array<i64: 1, 4, 256>}, {transform_indices = @transform_6, window_bounds = array<i64: 1, 4, 256>}]} {
    %c0 = arith.constant 0 : index
    %c0_0 = arith.constant 0 : index
    %c0_1 = arith.constant 0 : index
    %0 = vector.load %arg2[%c0, %c0_0, %c0_1] : memref<1x4x256xbf16, #tpu.memory_space<vmem>>, vector<1x4x256xbf16>
    %1 = vector.shape_cast %0 : vector<1x4x256xbf16> to vector<4x256xbf16>
    %c0_2 = arith.constant 0 : index
    %c0_3 = arith.constant 0 : index
    %2 = vector.load %arg3[%c0_2, %c0_3] : memref<4x4xbf16, #tpu.memory_space<vmem>>, vector<4x4xbf16>
    %cst = arith.constant dense<0.000000e+00> : vector<4x256xf32>
    %3 = tpu.matmul %2, %1, %cst {dimension_numbers = #tpu.dot_dimension_numbers<[1], [0], [0], [1], [0, 0, 1, 1], [], []>} : vector<4x4xbf16>, vector<4x256xbf16>, vector<4x256xf32> -> vector<4x256xf32>
    %c0_4 = arith.constant 0 : index
    %c0_5 = arith.constant 0 : index
    %4 = vector.load %arg4[%c0_4, %c0_5] : memref<4x1xf32, #tpu.memory_space<vmem>>, vector<4x1xf32>
    %5 = vector.broadcast %4 : vector<4x1xf32> to vector<4x256xf32>
    %6 = arith.addf %3, %5 : vector<4x256xf32>
    %c0_6 = arith.constant 0 : index
    %c0_7 = arith.constant 0 : index
    %7 = vector.load %arg5[%c0_6, %c0_7] : memref<4x4xbf16, #tpu.memory_space<vmem>>, vector<4x4xbf16>
    %cst_8 = arith.constant dense<0.000000e+00> : vector<4x256xf32>
    %8 = tpu.matmul %7, %1, %cst_8 {dimension_numbers = #tpu.dot_dimension_numbers<[1], [0], [0], [1], [0, 0, 1, 1], [], []>} : vector<4x4xbf16>, vector<4x256xbf16>, vector<4x256xf32> -> vector<4x256xf32>
    %c0_9 = arith.constant 0 : index
    %c0_10 = arith.constant 0 : index
    %9 = vector.load %arg6[%c0_9, %c0_10] : memref<4x1xf32, #tpu.memory_space<vmem>>, vector<4x1xf32>
    %10 = vector.broadcast %9 : vector<4x1xf32> to vector<4x256xf32>
    %11 = arith.addf %8, %10 : vector<4x256xf32>
    %12 = arith.truncf %6 : vector<4x256xf32> to vector<4x256xbf16>
    %c0_11 = arith.constant 0 : index
    %c0_12 = arith.constant 0 : index
    %c0_13 = arith.constant 0 : index
    %13 = vector.load %arg7[%c0_11, %c0_12, %c0_13] : memref<1x4x256xbf16, #tpu.memory_space<vmem>>, vector<1x4x256xbf16>
    %14 = vector.shape_cast %13 : vector<1x4x256xbf16> to vector<4x256xbf16>
    %15 = vector.shape_cast %12 : vector<4x256xbf16> to vector<1x4x256xbf16>
    tpu.vector_store %arg7[%c0_11, %c0_12, %c0_13], %15 {strides = array<i32>} : memref<1x4x256xbf16, #tpu.memory_space<vmem>>, vector<1x4x256xbf16>,
    %16 = arith.truncf %11 : vector<4x256xf32> to vector<4x256xbf16>
    %c0_14 = arith.constant 0 : index
    %c0_15 = arith.constant 0 : index
    %c0_16 = arith.constant 0 : index
    %17 = vector.load %arg8[%c0_14, %c0_15, %c0_16] : memref<1x4x256xbf16, #tpu.memory_space<vmem>>, vector<1x4x256xbf16>
    %18 = vector.shape_cast %17 : vector<1x4x256xbf16> to vector<4x256xbf16>
    %19 = vector.shape_cast %16 : vector<4x256xbf16> to vector<1x4x256xbf16>
    tpu.vector_store %arg8[%c0_14, %c0_15, %c0_16], %19 {strides = array<i32>} : memref<1x4x256xbf16, #tpu.memory_space<vmem>>, vector<1x4x256xbf16>,
    return
  }
  func.func @transform_0(%arg0: i32, %arg1: i32) -> (i32, i32, i32) {
    %c0_i32 = arith.constant 0 : i32
    %c0_i32_0 = arith.constant 0 : i32
    return %arg0, %c0_i32, %arg1 : i32, i32, i32
  }
  func.func @transform_1(%arg0: i32, %arg1: i32) -> (i32, i32) {
    %c0_i32 = arith.constant 0 : i32
    %c0_i32_0 = arith.constant 0 : i32
    %c0_i32_1 = arith.constant 0 : i32
    return %c0_i32, %c0_i32_0 : i32, i32
  }
  func.func @transform_2(%arg0: i32, %arg1: i32) -> (i32, i32) {
    %c0_i32 = arith.constant 0 : i32
    %c0_i32_0 = arith.constant 0 : i32
    %c0_i32_1 = arith.constant 0 : i32
    return %c0_i32, %c0_i32_0 : i32, i32
  }
  func.func @transform_3(%arg0: i32, %arg1: i32) -> (i32, i32) {
    %c0_i32 = arith.constant 0 : i32
    %c0_i32_0 = arith.constant 0 : i32
    %c0_i32_1 = arith.constant 0 : i32
    return %c0_i32, %c0_i32_0 : i32, i32
  }
  func.func @transform_4(%arg0: i32, %arg1: i32) -> (i32, i32) {
    %c0_i32 = arith.constant 0 : i32
    %c0_i32_0 = arith.constant 0 : i32
    %c0_i32_1 = arith.constant 0 : i32
    return %c0_i32, %c0_i32_0 : i32, i32
  }
  func.func @transform_5(%arg0: i32, %arg1: i32) -> (i32, i32, i32) {
    %c0_i32 = arith.constant 0 : i32
    %c0_i32_0 = arith.constant 0 : i32
    return %arg0, %c0_i32, %arg1 : i32, i32, i32
  }
  func.func @transform_6(%arg0: i32, %arg1: i32) -> (i32, i32, i32) {
    %c0_i32 = arith.constant 0 : i32
    %c0_i32_0 = arith.constant 0 : i32
    return %arg0, %c0_i32, %arg1 : i32, i32, i32
  }
}

</mosaic_0001>

<bundles_post_ra>
// kernel: tpu_custom_call.1
= control target key start
LH: loop header
LB: loop body
LE: loop exit
PB: predicated region body
PF: predicated region fallthrough
CT: control target
= control target key end

     0   :  { %12 = vsyncpa [#allocation3], 0  ;;  %s991_s0 = inlined_call_operand.vmem [shape: bf16[2,4,256], index: 0, kind: input, shape index: {}]   ;;  %s992_s1 = inlined_call_operand.vmem [shape: bf16[4,4], index: 1, kind: input, shape index: {}]   ;;  %s993_s2 = inlined_call_operand.vmem [shape: f32[4,1], index: 2, kind: input, shape index: {}]   ;;  %s994_s3 = inlined_call_operand.vmem [shape: bf16[4,4], index: 3, kind: input, shape index: {}]   ;;  %s995_s4 = inlined_call_operand.vmem [shape: f32[4,1], index: 4, kind: input, shape index: {}]   ;;  %s996_s5 = inlined_call_operand.hbm [shape: bf16[2,4,256], index: 5, kind: output, shape index: {0}]   ;;  %s997_s6 = inlined_call_operand.hbm [shape: bf16[2,4,256], index: 6, kind: output, shape index: {1}]  }
   0x1   :  { %14 = vsyncpa [#allocation3 + $0x1], 0 }
   0x2   :  { %15 = vsyncpa [#allocation5], 0 }
   0x3   :  { %17 = vsyncpa [#allocation5 + $0x1], 0  ;;  %s834_s21 = smov 0   ;;  %s836_s22 = smov 0  }
   0x4   :  { %s838_s23 = smov 0   ;;  %s840_s24 = smov 0  }
   0x5   :  { %s842_s25 = smov 0   ;;  %s844_s26 = smov 0  }
   0x6 LB: > { %s593_s27 = sadd.s32 4294967295, %s794_s26   ;;  %s594_s28 = sadd.s32 4294967294, %s794_s26   ;;  %s794_s26 = sphi %s844_s26, %s23_s26   ;;  %s790_s25 = sphi %s842_s25, %s1004_s25   ;;  %s786_s24 = sphi %s840_s24, %s1003_s24   ;;  %s782_s23 = sphi %s838_s23, %s1002_s23   ;;  %s778_s22 = sphi %s836_s22, %s1001_s22   ;;  %s774_s21 = sphi %s834_s21, %s1000_s21  }
   0x7   : > { %s35_s29 = sadd.s32 1, %s790_s25  ;;  %s156_s30 = sadd.s32 1, %s782_s23 }
   0x8   : > { %p37_p0 = scmp.ge.s32.totalorder %s35_s29, 2  ;;  %p166_p1 = scmp.ne.s32.totalorder %s782_s23, %s778_s22 }
   0x9   : > { %p167_p2 = scmp.eq.s32.totalorder %s593_s27, 1  ;;  %p172_p3 = scmp.ne.s32.totalorder %s778_s22, %s774_s21 }
   0xa   : > { %s1006_s29 = smov (%p37_p0, %s35_s29), 0  ;;  %p173_p5 = scmp.eq.s32.totalorder %s594_s28, 1 }
   0xb   : > { %p874_p4 = por %p167_p2, %p166_p1  ;;  %s151_s8 = ssub.s32 %s790_s25, %s1006_s29 }
   0xc   : > { %p597_p6 = scmp.ge.s32.totalorder %s794_s26, 1  ;;  %p154_p7 = scmp.eq.s32.totalorder %s151_s8, 0 }
   0xd   : > { %p881_p8 = por %p173_p5, %p172_p3  ;;  %p244_p9 = scmp.lt.s32.totalorder %s794_s26, 3 }
   0xe   : > { %s887_s10 = scalar_select %p154_p7, %s782_s23, %s156_s30  }
   0xf   : > { %p245_p10 = pnand %p597_p6, %p244_p9 }
  0x10   : > { %p284_p11 = scmp.lt.s32.totalorder (!%p245_p10), %s786_s24, 1  ;;  %v796_v0 = vmov (!%p245_p10), 0   ;;  %v298_v1 = vld [vmem:[%s993_s2] sm:$0xf] (!%p245_p10)  ;;  %vm317_vm0 = vcmask (!%p245_p10), 1041408   ;;  %vm313_vm1 = vcmask (!%p245_p10), 31744  }
  0x11   : > { %248 = sbr.rel (%p245_p10) target bundleno = 289 (0x121), region = 40  ;;  %356 = vmatprep.mubr.bf16.mxu0 (!%p245_p10), %v796_v0  ;;  %407 = vmatprep.mubr.bf16.mxu1 (!%p245_p10), %v796_v0  ;;  %v366_v2 = vld [vmem:[%s995_s4] sm:$0xf] (!%p245_p10)  ;;  %s907_s8 = sand.u32 (!%p245_p10), 1, %s778_s22  }
  0x12   : > { %683 = vset.pattern.permute.xlu0 (!%p245_p10), %v796_v0  ;;  %v297_v6 = vld [vmem:[%s992_s1] sm:$0x3] (!%p245_p10)  ;;  %s598_s11 = sshll.u32 (!%p245_p10), %s907_s8, 2  ;;  %s620_s12 = sshll.u32 (!%p245_p10), %s786_s24, 6 }
  0x13   : > { %301 = vperm.xlu0 (!%p245_p10), %683, %v298_v1   ;;  %v365_v7 = vld [vmem:[%s994_s3] sm:$0x3] (!%p245_p10)  ;;  %s282_s15 = scalar_lea.vmem (!%p245_p10), [#allocation4], %s598_s11  ;;  %s921_s27 = scalar_lea.hbm (!%p245_p10), %s997_s6, %s620_s12 }
  0x14   : > { %s482_s16 = sshll.u32 (!%p245_p10), %s282_s15, 4  ;;  %s445_s28 = scalar_lea.sflag (!%p245_p10), [#allocation3], %s907_s8  ;;  %s923_s16 = int_to_ptr.vmem [resolvable:$true] %s482_s16 }
  0x17   : > { %369 = vperm.xlu0 (!%p245_p10), %683, %v366_v2  }
  0x18   : > { %s285_s13 = scalar_select %p284_p11, %s786_s24, 1 }
  0x19   : > { %s914_s24 = scalar_lea.hbm %s996_s5, %s620_s12 }
  0x1a   : > { %s619_s14 = sshll.u32 %s285_s13, 2  ;;  %s275_s13 = scalar_lea.vmem [#allocation2], %s598_s11 }
  0x1b   : > { %s291_s19 = scalar_lea.vmem %s991_s0, %s619_s14  ;;  %s466_s14 = sshll.u32 %s275_s13, 4  ;;  %s916_s14 = int_to_ptr.vmem [resolvable:$true] %s466_s14 }
  0x1c   : > { %v602_v3 = vld.sshfl [vmem:[%s291_s19] sm:$0x33 pattern:$0x76325410]  ;;  %s684_s30 = scalar_lea.vmem %s916_s14, 64  ;;  %s797_s11 = smov [#allocation2]  }
  0x1d   : > { %v312_v4 = vcombine.high %v602_v3, %v602_v3  ;;  %v319_v5 = vsel %vm317_vm0, %v602_v3, 0  ;;  %p685_p12 = scmp.ne.s32.totalorder %s916_s14, %s684_s30  ;;  %s688_s17 = sshll.u32 %s797_s11, 4  ;;  %s689_s17 = int_to_ptr.vmem [resolvable:$false] %s688_s17 }
  0x1e   : > { %s690_s18 = scalar_lea.vmem %s689_s17, 128  ;;  %p691_p1 = scmp.lt.s32.totalorder %s916_s14, %s689_s17 }
  0x1f   : > { %603 = vmatprep.subr.msk.bf16.mxu0 %vm317_vm0, %v312_v4  ;;  %605 = vmatprep.subr.msk.bf16.mxu1 %vm317_vm0, %v312_v4  ;;  %p686_p13 = pnand %p685_p12, %p874_p4  ;;  %p692_p2 = scmp.lt.s32.totalorder %s690_s18, %s684_s30 }
  0x20   : > { %325 = vmatpush1.bf16.msra.mxu0 %v319_v5  ;;  %376 = vmatpush1.bf16.msra.mxu1 %v319_v5 }
  0x21   : > { %p687_p0 = pneg %p686_p13  ;;  %p693_p3 = por %p692_p2, %p691_p1 }
  0x23   : > { %604 = vmatmul.mubr.msk.bf16.vlgmr.msra.gmra.mrb[0].mxu0 %vm313_vm1, %v297_v6  ;;  %606 = vmatmul.mubr.msk.bf16.vlgmr.msra.gmra.mrb[0].mxu1 %vm313_vm1, %v365_v7  ;;  %p694_p5 = pnand %p693_p3, %p687_p0 }
  0x92   : > { %v302_v8 = vpop.permute.xlu0 %301 }
  0x96   : > { %v370_v9 = vpop.permute.xlu0 %369 }
  0xf6   : > { %v358_v10 = vpop.f32.mrb[0].mxu0  ;;  %v409_v11 = vpop.f32.mrb[0].mxu1 }
  0xf7   : > { %v359_v12 = vadd.f32 %v358_v10, %v302_v8  ;;  %v410_v13 = vadd.f32 %v409_v11, %v370_v9  ;;  %v360_v14 = vpop.f32.mrb[1].mxu0  ;;  %v411_v15 = vpop.f32.mrb[1].mxu1 }
  0xf8   : > { %v361_v16 = vadd.f32 %v360_v14, %v302_v8  ;;  %v412_v17 = vadd.f32 %v411_v15, %v370_v9  ;;  %v362_v18 = vpop.f32.mrb[2].mxu0  ;;  %v413_v19 = vpop.f32.mrb[2].mxu1 }
  0xf9   : > { %v363_v20 = vpop.f32.mrb[3].mxu0  ;;  %v414_v21 = vpop.f32.mrb[3].mxu1 }
  0xfa   : > { %v607_v22 = vpack.c.bf16 %v361_v16, %v359_v12  ;;  %v609_v23 = vpack.c.bf16 %v412_v17, %v410_v13 }
  0xfc   : > { %608 = vst.sshfl [vmem:[%s275_s13] sm:$0x33 pattern:$0x76325410] %v607_v22  ;;  %610 = vst.sshfl [vmem:[%s282_s15] sm:$0x33 pattern:$0x76325410] %v609_v23 }
  0xfd   : > { %697 = shalt.err (!%p694_p5)
}
  0xfe   : > { %s698_s12 = scalar_lea.hbm %s914_s24, 64  ;;  %s702_s19 = scalar_lea.hbm %s996_s5, 128 }
  0xff   : > { %p699_p6 = scmp.ne.s32.totalorder %s914_s24, %s698_s12  ;;  %p703_p10 = scmp.lt.u32.totalorder %s914_s24, %s996_s5 }
 0x100   : > { %p704_p11 = scmp.lt.u32.totalorder %s702_s19, %s698_s12  ;;  %p706_p13 = scmp.lt.u32.totalorder %s698_s12, %s914_s24 }
 0x101   : > { %p700_p7 = pnand %p699_p6, %p874_p4 }
 0x102   : > { %p705_p12 = por %p704_p11, %p703_p10 }
 0x103   : > { %p701_p9 = pneg %p700_p7 }
 0x104   : > { %p707_p0 = por %p706_p13, %p705_p12 }
 0x106   : > { %p708_p1 = pnand %p707_p0, %p701_p9 }
 0x108   : > { %711 = shalt.err (!%p708_p1)
}
 0x109   : > { %622 = dma.vmem_to_hbm [thread:$0]  (%p874_p4), %s916_s14, 64, %s914_s24, %s445_s28  }
 0x10a   : > { %s450_s30 = scalar_lea.sflag [#allocation5], %s907_s8  ;;  %s712_s17 = scalar_lea.vmem %s923_s16, 64 }
 0x10b   : > { %p713_p2 = scmp.ne.s32.totalorder %s923_s16, %s712_s17  ;;  %s798_s18 = smov [#allocation4]  }
 0x10c   : > { %s716_s12 = sshll.u32 %s798_s18, 4  ;;  %s717_s12 = int_to_ptr.vmem [resolvable:$false] %s716_s12 }
 0x10d   : > { %p714_p3 = pnand %p713_p2, %p874_p4  ;;  %s718_s13 = scalar_lea.vmem %s717_s12, 128 }
 0x10e   : > { %p719_p6 = scmp.lt.s32.totalorder %s923_s16, %s717_s12  ;;  %p720_p7 = scmp.lt.s32.totalorder %s718_s13, %s712_s17 }
 0x10f   : > { %p715_p5 = pneg %p714_p3 }
 0x110   : > { %p721_p9 = por %p720_p7, %p719_p6 }
 0x112   : > { %p722_p10 = pnand %p721_p9, %p715_p5 }
 0x114   : > { %725 = shalt.err (!%p722_p10)
}
 0x115   : > { %s726_s8 = scalar_lea.hbm %s921_s27, 64  ;;  %s730_s28 = scalar_lea.hbm %s997_s6, 128 }
 0x116   : > { %p727_p11 = scmp.ne.s32.totalorder %s921_s27, %s726_s8  ;;  %p731_p0 = scmp.lt.u32.totalorder %s921_s27, %s997_s6 }
 0x117   : > { %p732_p1 = scmp.lt.u32.totalorder %s730_s28, %s726_s8  ;;  %p734_p3 = scmp.lt.u32.totalorder %s726_s8, %s921_s27 }
 0x118   : > { %p728_p12 = pnand %p727_p11, %p874_p4 }
 0x119   : > { %p733_p2 = por %p732_p1, %p731_p0 }
 0x11a   : > { %p729_p13 = pneg %p728_p12 }
 0x11b   : > { %p735_p5 = por %p734_p3, %p733_p2 }
 0x11d   : > { %p736_p6 = pnand %p735_p5, %p729_p13 }
 0x11f   : > { %739 = shalt.err (!%p736_p6)
}
 0x120   : > { %623 = dma.vmem_to_hbm [thread:$0]  (%p874_p4), %s923_s16, 64, %s921_s27, %s450_s30  }
 0x121 PF: > { %p633_p7 = scmp.ge.s32.totalorder %s794_s26, 2  ;;  %s494_s20 = sand.u32 1, %s774_s21  }
 0x122   : > { %s495_s11 = scalar_lea.sflag [#allocation3], %s494_s20 }
 0x123   : > { %p627_p9 = pnand %p633_p7, %p881_p8 }
 0x125   : > { %765 = dma.done.wait (!%p627_p9), %s495_s11, 64  }
 0x126   : > { %767 = vsyncadd (!%p627_p9), %s495_s11, 4294967232  ;;  %s504_s17 = scalar_lea.sflag [#allocation5], %s494_s20 }
 0x127   : > { %769 = dma.done.wait (!%p627_p9), %s504_s17, 64  }
 0x128   : > { %771 = vsyncadd (!%p627_p9), %s504_s17, 4294967232  ;;  %s23_s26 = sadd.s32 1, %s794_s26   ;;  %s1000_s21 = smov %s778_s22 }
 0x129   : > { %p20_p10 = scmp.ge.s32.totalorder %s23_s26, 4   ;;  %s1001_s22 = smov %s782_s23 }
 0x12a   : > { %s1002_s23 = smov %s887_s10  ;;  %s1003_s24 = smov %s790_s25 }
 0x12b   : > { %s1004_s25 = smov %s1006_s29  ;;  %22 = sbr.rel (!%p20_p10) target bundleno = 6 (0x6), region = 92 }
 0x132   :  { %509 = vsyncpa [#allocation3], 1 }
 0x133   :  { %511 = vsyncpa [#allocation3 + $0x1], 1 }
 0x134   :  { %512 = vsyncpa [#allocation5], 1 }
 0x135   :  { %514 = vsyncpa [#allocation5 + $0x1], 1 }

</bundles_post_ra>
